<compile_context>
chip_gen: v7x
topology: tpu7x:2x2x1
jax: 0.10.0
libtpu: 0.0.40
codegen_flags: <defaults>
</compile_context>

<pallas_src>
import math

import jax
import jax.numpy as jnp
from jax.experimental import pallas as pl
from jax.experimental.pallas import tpu as pltpu


def _round_up(x, m):
    return (x + m - 1) // m * m


# ---------------------------------------------------------------------------
# Kernel 1: feature transform  H = (X @ W) * norm   (stored as bf16)
# ---------------------------------------------------------------------------
def _feature_kernel(x_ref, w_ref, norm_ref, h_ref):
    h = jnp.dot(x_ref[...], w_ref[...], preferred_element_type=jnp.float32)
    h_ref[...] = (h * norm_ref[...]).astype(h_ref.dtype)


# ---------------------------------------------------------------------------
# Kernel 2: neighborhood aggregation  out = (A @ H) * norm + bias
# ---------------------------------------------------------------------------
def _aggregate_kernel(a_ref, h_ref, norm_ref, bias_ref, o_ref, acc_ref):
    k = pl.program_id(1)

    @pl.when(k == 0)
    def _():
        acc_ref[...] = jnp.zeros_like(acc_ref)

    # bf16 x bf16 -> f32 accumulation on the MXU.
    acc_ref[...] += jnp.dot(a_ref[...], h_ref[...],
                            preferred_element_type=jnp.float32)

    @pl.when(k == pl.num_programs(1) - 1)
    def _():
        o_ref[...] = (acc_ref[...] * norm_ref[...]
                      + bias_ref[...]).astype(o_ref.dtype)


def gcn_layer_forward(adj, x, weight, norm, bias, *, tm=128, tk=128):
    """GCN layer forward: (A @ ((X @ W) * norm)) * norm + bias."""
    n, in_feats = x.shape
    out_feats = weight.shape[1]

    tm = min(tm, n)
    tk = min(tk, n)
    assert n % tm == 0 and n % tk == 0, "N must be divisible by the tile sizes"

    # Lane-dense output: pad the output feature dim to a multiple of 128.
    f_pad = _round_up(out_feats, 128)
    w_pad = jnp.zeros((in_feats, f_pad), jnp.float32)
    w_pad = w_pad.at[:, :out_feats].set(weight.astype(jnp.float32))
    b_pad = jnp.zeros((1, f_pad), jnp.float32)
    b_pad = b_pad.at[0, :out_feats].set(jnp.reshape(bias, (-1,)).astype(jnp.float32))

    norm = jnp.reshape(norm, (n, 1)).astype(jnp.float32)
    # A is {0, 1}: bf16 is lossless and halves the dominant HBM stream.
    adj_bf16 = adj.astype(jnp.bfloat16)

    # ---- H = (X @ W) * norm, row-tiled, stored as bf16 --------------------
    h = pl.pallas_call(
        _feature_kernel,
        out_shape=jax.ShapeDtypeStruct((n, f_pad), jnp.bfloat16),
        grid_spec=pltpu.PrefetchScalarGridSpec(
            num_scalar_prefetch=0,
            grid=(n // tm,),
            in_specs=[
                pl.BlockSpec((tm, in_feats), lambda i: (i, 0)),
                pl.BlockSpec((in_feats, f_pad), lambda i: (0, 0)),
                pl.BlockSpec((tm, 1), lambda i: (i, 0)),
            ],
            out_specs=pl.BlockSpec((tm, f_pad), lambda i: (i, 0)),
        ),
        compiler_params=pltpu.CompilerParams(
            dimension_semantics=("parallel",)),
    )(x.astype(jnp.float32), w_pad, norm)

    # ---- out = (A @ H) * norm + bias, (row, neighbor) tiled ---------------
    cost = pl.CostEstimate(
        flops=2 * n * n * f_pad + 2 * n * in_feats * f_pad,
        transcendentals=0,
        bytes_accessed=(n * n * 2          # A (bf16)
                        + n * f_pad * 2    # H (bf16)
                        + n * f_pad * 4    # out (f32)
                        + n * 4 + f_pad * 4),
    )
    out_pad = pl.pallas_call(
        _aggregate_kernel,
        out_shape=jax.ShapeDtypeStruct((n, f_pad), jnp.float32),
        grid_spec=pltpu.PrefetchScalarGridSpec(
            num_scalar_prefetch=0,
            grid=(n // tm, n // tk),
            in_specs=[
                pl.BlockSpec((tm, tk), lambda i, k: (i, k)),       # A tile
                pl.BlockSpec((tk, f_pad), lambda i, k: (k, 0)),    # H tile
                pl.BlockSpec((tm, 1), lambda i, k: (i, 0)),        # row norm
                pl.BlockSpec((1, f_pad), lambda i, k: (0, 0)),     # bias (resident)
            ],
            out_specs=pl.BlockSpec((tm, f_pad), lambda i, k: (i, 0)),
            scratch_shapes=[pltpu.VMEM((tm, f_pad), jnp.float32)],
        ),
        compiler_params=pltpu.CompilerParams(
            dimension_semantics=("parallel", "arbitrary")),
        cost_estimate=cost,
    )(adj_bf16, h, norm, b_pad)

    return out_pad[:, :out_feats]


def _xavier_uniform(key, in_feats, out_feats):
    bound = math.sqrt(6.0 / (in_feats + out_feats))
    return jax.random.uniform(
        key, (in_feats, out_feats), dtype=jnp.float32, minval=-bound, maxval=bound
    )


if __name__ == "__main__":
    key = jax.random.PRNGKey(0)
    k_adj, k_x, k_w = jax.random.split(key, 3)

    N = 256          # number of graph nodes
    IN_FEATS = 16
    OUT_FEATS = 32

    # Deterministic random graph: symmetric adjacency with self-loops.
    logits = jax.random.uniform(k_adj, (N, N), dtype=jnp.float32)
    adj = (logits > 0.8).astype(jnp.float32)
    adj = jnp.maximum(adj, adj.T)
    adj = jnp.maximum(adj, jnp.eye(N, dtype=jnp.float32))

    # Symmetric GCN normalization: norm = deg^{-1/2}, shape [N, 1].
    deg = jnp.sum(adj, axis=1, keepdims=True)
    norm = 1.0 / jnp.sqrt(deg)

    # Node features.
    x = jax.random.normal(k_x, (N, IN_FEATS), dtype=jnp.float32)

    # Parameters (xavier_uniform weight, zero bias, as in the module's __init__).
    weight = _xavier_uniform(k_w, IN_FEATS, OUT_FEATS)
    bias = jnp.zeros((OUT_FEATS,), dtype=jnp.float32)

    out = gcn_layer_forward(adj, x, weight, norm, bias)
    out = jax.block_until_ready(out)

    # Pure-JAX f32 reference (kernel keeps H/A in bf16 -> use a loose bound).
    ref = (adj @ ((x @ weight) * norm)) * norm + bias
    assert out.shape == (N, OUT_FEATS)
    max_err = float(jnp.max(jnp.abs(out - ref)))
    assert jnp.allclose(out, ref, atol=2e-2, rtol=2e-2), f"max_err={max_err}"

    print("KERNEL_OK")
</pallas_src>

<mosaic_0001>
module attributes {stable_mosaic.version = 11 : i64} {
  func.func @_feature_kernel(%arg0: i32, %arg1: memref<128x16xf32, #tpu.memory_space<vmem>>, %arg2: memref<16x128xf32, #tpu.memory_space<vmem>>, %arg3: memref<128x1xf32, #tpu.memory_space<vmem>>, %arg4: memref<128x128xbf16, #tpu.memory_space<vmem>>) attributes {dimension_semantics = [#tpu.dimension_semantics<parallel>], iteration_bounds = array<i64: 2>, scalar_prefetch = 0 : i64, scratch_operands = 0 : i64, tpu.core_type = #tpu.core_type<tc>, window_params = [{transform_indices = @transform_0, window_bounds = array<i64: 128, 16>}, {pipeline_mode = #tpu.pipeline_mode<synchronous>, transform_indices = @transform_1, window_bounds = array<i64: 16, 128>}, {transform_indices = @transform_2, window_bounds = array<i64: 128, 1>}, {transform_indices = @transform_3, window_bounds = array<i64: 128, 128>}]} {
    %c0 = arith.constant 0 : index
    %c0_0 = arith.constant 0 : index
    %0 = vector.load %arg1[%c0, %c0_0] : memref<128x16xf32, #tpu.memory_space<vmem>>, vector<128x16xf32>
    %c0_1 = arith.constant 0 : index
    %c0_2 = arith.constant 0 : index
    %1 = vector.load %arg2[%c0_1, %c0_2] : memref<16x128xf32, #tpu.memory_space<vmem>>, vector<16x128xf32>
    %cst = arith.constant dense<0.000000e+00> : vector<128x128xf32>
    %2 = tpu.matmul %0, %1, %cst {dimension_numbers = #tpu.dot_dimension_numbers<[1], [0], [0], [1], [0, 0, 1, 1], [], []>} : vector<128x16xf32>, vector<16x128xf32>, vector<128x128xf32> -> vector<128x128xf32>
    %c0_3 = arith.constant 0 : index
    %c0_4 = arith.constant 0 : index
    %3 = vector.load %arg3[%c0_3, %c0_4] : memref<128x1xf32, #tpu.memory_space<vmem>>, vector<128x1xf32>
    %4 = vector.broadcast %3 : vector<128x1xf32> to vector<128x128xf32>
    %5 = arith.mulf %2, %4 : vector<128x128xf32>
    %6 = arith.truncf %5 : vector<128x128xf32> to vector<128x128xbf16>
    %c0_5 = arith.constant 0 : index
    %c0_6 = arith.constant 0 : index
    %7 = vector.load %arg4[%c0_5, %c0_6] : memref<128x128xbf16, #tpu.memory_space<vmem>>, vector<128x128xbf16>
    tpu.vector_store %arg4[%c0_5, %c0_6], %6 {strides = array<i32>} : memref<128x128xbf16, #tpu.memory_space<vmem>>, vector<128x128xbf16>,
    return
  }
  func.func @transform_0(%arg0: i32) -> (i32, i32) {
    %c0_i32 = arith.constant 0 : i32
    %c0_i32_0 = arith.constant 0 : i32
    return %arg0, %c0_i32 : i32, i32
  }
  func.func @transform_1(%arg0: i32) -> (i32, i32) {
    %c0_i32 = arith.constant 0 : i32
    %c0_i32_0 = arith.constant 0 : i32
    %c0_i32_1 = arith.constant 0 : i32
    return %c0_i32, %c0_i32_0 : i32, i32
  }
  func.func @transform_2(%arg0: i32) -> (i32, i32) {
    %c0_i32 = arith.constant 0 : i32
    %c0_i32_0 = arith.constant 0 : i32
    return %arg0, %c0_i32 : i32, i32
  }
  func.func @transform_3(%arg0: i32) -> (i32, i32) {
    %c0_i32 = arith.constant 0 : i32
    %c0_i32_0 = arith.constant 0 : i32
    return %arg0, %c0_i32 : i32, i32
  }
}

</mosaic_0001>

<bundles_post_ra>
// kernel: tpu_custom_call.1
= control target key start
LH: loop header
LB: loop body
LE: loop exit
PB: predicated region body
PF: predicated region fallthrough
CT: control target
= control target key end

     0   :  { %8 = vsyncpa [#allocation3], 0  ;;  %s1158_s0 = inlined_call_operand.vmem [shape: f32[256,16], index: 0, kind: input, shape index: {}]   ;;  %s1159_s1 = inlined_call_operand.vmem [shape: f32[16,128], index: 1, kind: input, shape index: {}]   ;;  %s1160_s2 = inlined_call_operand.vmem [shape: f32[256,1], index: 2, kind: input, shape index: {}]   ;;  %s1161_s3 = inlined_call_operand.hbm [shape: bf16[256,128], index: 3, kind: output, shape index: {}]  }
   0x1   :  { %10 = vsyncpa [#allocation3 + $0x1], 0  ;;  %s980_s12 = smov 0   ;;  %s982_s13 = smov 0  }
   0x2   :  { %s984_s14 = smov 0   ;;  %s986_s15 = smov 0  }
   0x3 LB: > { %s1001_s16 = sadd.s32 4294967295, %s954_s15   ;;  %s686_s17 = sadd.s32 4294967294, %s954_s15   ;;  %s954_s15 = sphi %s986_s15, %s1167_s15   ;;  %s950_s14 = sphi %s984_s14, %s1166_s14   ;;  %s946_s13 = sphi %s982_s13, %s1165_s13   ;;  %s942_s12 = sphi %s980_s12, %s1164_s12  }
   0x4   : > { %s1005_s18 = sadd.s32 1, %s954_s15   ;;  %s96_s19 = sadd.s32 1, %s950_s14 }
   0x5   : > { %s93_s20 = ssub.s32 %s954_s15, %s1005_s18  ;;  %p106_p0 = scmp.ne.s32.totalorder %s950_s14, %s946_s13 }
   0x6   : > { %p94_p1 = scmp.eq.s32.totalorder %s93_s20, 0  ;;  %p107_p2 = scmp.eq.s32.totalorder %s1001_s16, 1 }
   0x7   : > { %p112_p3 = scmp.ne.s32.totalorder %s946_s13, %s942_s12  ;;  %p113_p4 = scmp.eq.s32.totalorder %s686_s17, 1 }
   0x8   : > { %s1016_s21 = scalar_select %p94_p1, %s950_s14, %s96_s19  }
   0x9   : > { %p1018_p5 = por %p107_p2, %p106_p0  ;;  %p1022_p6 = por %p113_p4, %p112_p3 }
   0xa   : > { %p689_p7 = scmp.ge.s32.totalorder %s954_s15, 1  ;;  %p152_p8 = scmp.lt.s32.totalorder %s954_s15, 3 }
   0xc   : > { %p153_p9 = pnand %p689_p7, %p152_p8 }
   0xd   : > { %v210_v0 = vld [vmem:[%s1159_s1] sm:$0xff] (!%p153_p9)  ;;  %v211_v1 = vld [vmem:[%s1159_s1 + $0x8] sm:$0xff] (!%p153_p9)  ;;  %s691_s28 = sshll.u32 (!%p153_p9), %s1001_s16, 4  ;;  %v956_v3 = vmov (!%p153_p9), 0   ;;  %vm212_vm0 = vcmask (!%p153_p9), 130048   ;;  %s178_s9 = sand.u32 (!%p153_p9), 1, %s946_s13  }
   0xe   : > { %156 = sbr.rel (%p153_p9) target bundleno = 271 (0x10f), region = 32  ;;  %v842_v2 = vpack.c.bf16 (!%p153_p9), %v211_v1, %v210_v0  ;;  %p182_p10 = scmp.lt.s32.totalorder (!%p153_p9), %s691_s28, 31  ;;  %891 = vset.pattern.permute.xlu1 (!%p153_p9), %v956_v3  ;;  %890 = vset.pattern.permute.xlu0 (!%p153_p9), %v956_v3 }
   0xf   : > { %s690_s10 = sshll.u32 (!%p153_p9), %s178_s9, 6  ;;  %s748_s17 = sshll.u32 (!%p153_p9), %s1001_s16, 10 }
  0x10   : > { %843 = vmatprep.subr.bf16.mxu0 (!%p153_p9), %v842_v2  ;;  %846 = vmatprep.subr.bf16.mxu1 (!%p153_p9), %v842_v2  ;;  %s1096_s11 = scalar_lea.vmem (!%p153_p9), [#allocation2], %s690_s10  ;;  %s1109_s25 = scalar_lea.hbm (!%p153_p9), %s1161_s3, %s748_s17 }
  0x11   : > { %845 = vmatpush3.bf16.msra.mxu0 (!%p153_p9), %v842_v2  ;;  %847 = vmatpush3.bf16.msra.mxu1 (!%p153_p9), %v842_v2  ;;  %s612_s19 = sshll.u32 (!%p153_p9), %s1096_s11, 4  ;;  %s1117_s16 = scalar_lea.sflag (!%p153_p9), [#allocation3], %s178_s9  ;;  %s1111_s19 = int_to_ptr.vmem [resolvable:$true] %s612_s19 }
  0x12   : > { %s892_s26 = scalar_lea.vmem (!%p153_p9), %s1111_s19, 1024  ;;  %s957_s27 = smov (!%p153_p9), [#allocation2]  }
  0x13   : > { %p893_p11 = scmp.ne.s32.totalorder (!%p153_p9), %s1111_s19, %s892_s26 }
  0x15   : > { %s1169_s28 = smov (!%p182_p10, %s691_s28), 31  ;;  %p894_p12 = pnand %p893_p11, %p1018_p5 }
  0x16   : > { %s692_s29 = sshll.u32 %s1169_s28, 3  ;;  %s896_s28 = sshll.u32 %s957_s27, 4  ;;  %s897_s28 = int_to_ptr.vmem [resolvable:$false] %s896_s28 }
  0x17   : > { %s1038_s5 = scalar_lea.vmem %s1158_s0, %s692_s29  ;;  %s1053_s8 = scalar_lea.vmem %s1160_s2, %s692_s29 }
  0x18   : > { %v194_v4 = vld [vmem:[%s1038_s5] sm:$0xff]  ;;  %v195_v6 = vld [vmem:[%s1038_s5 + $0x8] sm:$0xff]  ;;  %v196_v8 = vld [vmem:[%s1038_s5 + $0x10] sm:$0xff]  ;;  %p895_p13 = pneg %p894_p12  ;;  %s898_s29 = scalar_lea.vmem %s897_s28, 2048 }
  0x19   : > { %v202_v5 = vld [vmem:[%s1038_s5 + $0x40] sm:$0xff]  ;;  %818 = vmatprep.mubr.msk.f32.mxu0 %vm212_vm0, %v194_v4  ;;  %v203_v7 = vld [vmem:[%s1038_s5 + $0x48] sm:$0xff]  ;;  %v204_v9 = vld [vmem:[%s1038_s5 + $0x50] sm:$0xff]  ;;  %p899_p0 = scmp.lt.s32.totalorder %s1111_s19, %s897_s28  ;;  %p900_p1 = scmp.lt.s32.totalorder %s898_s29, %s892_s26 }
  0x1a   : > { %830 = vmatprep.mubr.msk.f32.mxu1 %vm212_vm0, %v202_v5  ;;  %819 = vmatmul.mubr.msk.f32.vlgmr.msra.gmra.mrb[0].mxu0 %vm212_vm0, %v195_v6  ;;  %v197_v10 = vld [vmem:[%s1038_s5 + $0x18] sm:$0xff]  ;;  %v198_v12 = vld [vmem:[%s1038_s5 + $0x20] sm:$0xff]  ;;  %v408_v14 = vld [vmem:[%s1053_s8 + $0x10] sm:$0xff] }
  0x1b   : > { %831 = vmatmul.mubr.msk.f32.vlgmr.msra.gmra.mrb[0].mxu1 %vm212_vm0, %v203_v7  ;;  %821 = vmatprep.mubr.msk.f32.mxu0 %vm212_vm0, %v196_v8  ;;  %v205_v11 = vld [vmem:[%s1038_s5 + $0x58] sm:$0xff]  ;;  %v206_v13 = vld [vmem:[%s1038_s5 + $0x60] sm:$0xff]  ;;  %v199_v16 = vld [vmem:[%s1038_s5 + $0x28] sm:$0xff]  ;;  %p901_p2 = por %p900_p1, %p899_p0 }
  0x1c   : > { %833 = vmatprep.mubr.msk.f32.mxu1 %vm212_vm0, %v204_v9  ;;  %v406_v15 = vld [vmem:[%s1053_s8] sm:$0xff]  ;;  %v207_v17 = vld [vmem:[%s1038_s5 + $0x68] sm:$0xff]  ;;  %v200_v18 = vld [vmem:[%s1038_s5 + $0x30] sm:$0xff]  ;;  %434 = vperm.xlu1 %891, %v408_v14  }
  0x1d   : > { %v208_v19 = vld [vmem:[%s1038_s5 + $0x70] sm:$0xff]  ;;  %424 = vperm.xlu0 %890, %v406_v15   ;;  %v409_v20 = vld [vmem:[%s1053_s8 + $0x18] sm:$0xff]  ;;  %v407_v21 = vld [vmem:[%s1053_s8 + $0x8] sm:$0xff]  ;;  %p902_p3 = pnand %p901_p2, %p895_p13 }
  0x1e   : > { %822 = vmatmul.mubr.msk.f32.gmra.mrb[2].mxu0 %vm212_vm0, %v197_v10  ;;  %v201_v22 = vld [vmem:[%s1038_s5 + $0x38] sm:$0xff]  ;;  %v411_v24 = vld [vmem:[%s1053_s8 + $0x28] sm:$0xff]  ;;  %v410_v25 = vld [vmem:[%s1053_s8 + $0x20] sm:$0xff] }
  0x1f   : > { %834 = vmatmul.mubr.msk.f32.gmra.mrb[2].mxu1 %vm212_vm0, %v205_v11  ;;  %824 = vmatprep.mubr.msk.f32.mxu0 %vm212_vm0, %v198_v12  ;;  %v209_v23 = vld [vmem:[%s1038_s5 + $0x78] sm:$0xff]  ;;  %v412_v27 = vld [vmem:[%s1053_s8 + $0x30] sm:$0xff]  ;;  %v415_v28 = vld [vmem:[%s1053_s8 + $0x48] sm:$0xff] }
  0x20   : > { %836 = vmatprep.mubr.msk.f32.mxu1 %vm212_vm0, %v206_v13  ;;  %439 = vperm.xlu1 %891, %v409_v20   ;;  %v413_v26 = vld [vmem:[%s1053_s8 + $0x38] sm:$0xff]  ;;  %v414_v29 = vld [vmem:[%s1053_s8 + $0x40] sm:$0xff]  ;;  %v416_v31 = vld [vmem:[%s1053_s8 + $0x50] sm:$0xff] }
  0x21   : > { %429 = vperm.xlu0 %890, %v407_v21   ;;  %v417_v30 = vld [vmem:[%s1053_s8 + $0x58] sm:$0xff]  ;;  %v419_v32 = vld [vmem:[%s1053_s8 + $0x68] sm:$0xff]  ;;  %v418_v33 = vld [vmem:[%s1053_s8 + $0x60] sm:$0xff] }
  0x22   : > { %825 = vmatmul.mubr.msk.f32.gmra.mrb[4].mxu0 %vm212_vm0, %v199_v16  ;;  %v421_v34 = vld [vmem:[%s1053_s8 + $0x78] sm:$0xff]  ;;  %v420_v35 = vld [vmem:[%s1053_s8 + $0x70] sm:$0xff] }
  0x23   : > { %837 = vmatmul.mubr.msk.f32.gmra.mrb[4].mxu1 %vm212_vm0, %v207_v17  ;;  %827 = vmatprep.mubr.msk.f32.mxu0 %vm212_vm0, %v200_v18 }
  0x24   : > { %839 = vmatprep.mubr.msk.f32.mxu1 %vm212_vm0, %v208_v19  ;;  %449 = vperm.xlu1 %891, %v411_v24  }
  0x25   : > { %444 = vperm.xlu0 %890, %v410_v25  }
  0x26   : > { %828 = vmatmul.mubr.msk.f32.gmra.mrb[6].mxu0 %vm212_vm0, %v201_v22 }
  0x27   : > { %840 = vmatmul.mubr.msk.f32.gmra.mrb[6].mxu1 %vm212_vm0, %v209_v23 }
  0x28   : > { %459 = vperm.xlu1 %891, %v413_v26  }
  0x29   : > { %454 = vperm.xlu0 %890, %v412_v27  }
  0x2c   : > { %469 = vperm.xlu1 %891, %v415_v28  }
  0x2d   : > { %464 = vperm.xlu0 %890, %v414_v29  }
  0x30   : > { %479 = vperm.xlu1 %891, %v417_v30  }
  0x31   : > { %474 = vperm.xlu0 %890, %v416_v31  }
  0x34   : > { %489 = vperm.xlu1 %891, %v419_v32  }
  0x35   : > { %484 = vperm.xlu0 %890, %v418_v33  }
  0x38   : > { %499 = vperm.xlu1 %891, %v421_v34  }
  0x39   : > { %494 = vperm.xlu0 %890, %v420_v35  }
  0x9b   : > { %v435_v36 = vpop.permute.xlu1 %434 }
  0x9c   : > { %v425_v37 = vpop.permute.xlu0 %424 }
  0x9f   : > { %v440_v38 = vpop.permute.xlu1 %439 }
  0xa0   : > { %v430_v39 = vpop.permute.xlu0 %429 }
  0xa3   : > { %v450_v40 = vpop.permute.xlu1 %449 }
  0xa4   : > { %v445_v41 = vpop.permute.xlu0 %444 }
  0xa7   : > { %v460_v42 = vpop.permute.xlu1 %459 }
  0xa8   : > { %v455_v43 = vpop.permute.xlu0 %454 }
  0xab   : > { %v470_v44 = vpop.permute.xlu1 %469 }
  0xac   : > { %v465_v45 = vpop.permute.xlu0 %464 }
  0xaf   : > { %v480_v46 = vpop.permute.xlu1 %479 }
  0xb0   : > { %v475_v47 = vpop.permute.xlu0 %474 }
  0xb3   : > { %v490_v56 = vpop.permute.xlu1 %489 }
  0xb4   : > { %v485_v57 = vpop.permute.xlu0 %484 }
  0xb7   : > { %v500_v14 = vpop.permute.xlu1 %499 }
  0xb8   : > { %v495_v15 = vpop.permute.xlu0 %494 }
  0xed   : > { %v820_v48 = vpop.f32.mrb[0].mxu0 }
  0xee   : > { %v832_v49 = vpop.f32.mrb[0].mxu1  ;;  %v503_v50 = vmul.f32 %v820_v48, %v430_v39  ;;  %v327_v52 = vpop.f32.mrb[1].mxu0 }
  0xef   : > { %v511_v51 = vmul.f32 %v832_v49, %v470_v44  ;;  %v367_v53 = vpop.f32.mrb[1].mxu1  ;;  %v502_v54 = vmul.f32 %v425_v37, %v327_v52 }
  0xf0   : > { %v510_v55 = vmul.f32 %v465_v45, %v367_v53 }
  0xf1   : > { %v752_v58 = vpack.c.bf16 %v503_v50, %v502_v54  ;;  %v823_v60 = vpop.f32.mrb[2].mxu0 }
  0xf2   : > { %v772_v59 = vpack.c.bf16 %v511_v51, %v510_v55  ;;  %v835_v61 = vpop.f32.mrb[2].mxu1  ;;  %v505_v62 = vmul.f32 %v823_v60, %v440_v38  ;;  %v337_v0 = vpop.f32.mrb[3].mxu0 }
  0xf3   : > { %v513_v63 = vmul.f32 %v835_v61, %v480_v46  ;;  %v377_v1 = vpop.f32.mrb[3].mxu1  ;;  %753 = vst [vmem:[%s1096_s11] sm:$0xff] %v752_v58   ;;  %v504_v2 = vmul.f32 %v435_v36, %v337_v0 }
  0xf4   : > { %792 = vst [vmem:[%s1096_s11 + $0x20] sm:$0xff] %v772_v59   ;;  %v512_v3 = vmul.f32 %v475_v47, %v377_v1 }
  0xf5   : > { %v757_v4 = vpack.c.bf16 %v505_v62, %v504_v2  ;;  %v826_v6 = vpop.f32.mrb[4].mxu0 }
  0xf6   : > { %v777_v5 = vpack.c.bf16 %v513_v63, %v512_v3  ;;  %v838_v7 = vpop.f32.mrb[4].mxu1  ;;  %v507_v8 = vmul.f32 %v826_v6, %v450_v40  ;;  %v347_v10 = vpop.f32.mrb[5].mxu0 }
  0xf7   : > { %v515_v9 = vmul.f32 %v838_v7, %v490_v56  ;;  %v387_v11 = vpop.f32.mrb[5].mxu1  ;;  %789 = vst [vmem:[%s1096_s11 + $0x8] sm:$0xff] %v757_v4   ;;  %v506_v12 = vmul.f32 %v445_v41, %v347_v10 }
  0xf8   : > { %793 = vst [vmem:[%s1096_s11 + $0x28] sm:$0xff] %v777_v5   ;;  %v514_v13 = vmul.f32 %v485_v57, %v387_v11 }
  0xf9   : > { %v762_v16 = vpack.c.bf16 %v507_v8, %v506_v12  ;;  %v829_v18 = vpop.f32.mrb[6].mxu0 }
  0xfa   : > { %v782_v17 = vpack.c.bf16 %v515_v9, %v514_v13  ;;  %v841_v19 = vpop.f32.mrb[6].mxu1  ;;  %v509_v20 = vmul.f32 %v829_v18, %v460_v42  ;;  %v357_v22 = vpop.f32.mrb[7].mxu0 }
  0xfb   : > { %v517_v21 = vmul.f32 %v841_v19, %v500_v14  ;;  %v397_v23 = vpop.f32.mrb[7].mxu1  ;;  %790 = vst [vmem:[%s1096_s11 + $0x10] sm:$0xff] %v762_v16   ;;  %v508_v24 = vmul.f32 %v455_v43, %v357_v22 }
  0xfc   : > { %794 = vst [vmem:[%s1096_s11 + $0x30] sm:$0xff] %v782_v17   ;;  %v516_v25 = vmul.f32 %v495_v15, %v397_v23 }
  0xfd   : > { %v767_v26 = vpack.c.bf16 %v509_v20, %v508_v24 }
  0xfe   : > { %v787_v27 = vpack.c.bf16 %v517_v21, %v516_v25 }
  0xff   : > { %791 = vst [vmem:[%s1096_s11 + $0x18] sm:$0xff] %v767_v26  }
 0x100   : > { %795 = vst [vmem:[%s1096_s11 + $0x38] sm:$0xff] %v787_v27  }
 0x101   : > { %905 = shalt.err (!%p902_p3)
}
 0x102   : > { %s906_s30 = scalar_lea.hbm %s1109_s25, 1024  ;;  %s910_s6 = scalar_lea.hbm %s1161_s3, 2048 }
 0x103   : > { %p907_p4 = scmp.ne.s32.totalorder %s1109_s25, %s906_s30  ;;  %p911_p9 = scmp.lt.u32.totalorder %s1109_s25, %s1161_s3 }
 0x104   : > { %p912_p10 = scmp.lt.u32.totalorder %s910_s6, %s906_s30  ;;  %p914_p12 = scmp.lt.u32.totalorder %s906_s30, %s1109_s25 }
 0x105   : > { %p908_p7 = pnand %p907_p4, %p1018_p5 }
 0x106   : > { %p913_p11 = por %p912_p10, %p911_p9 }
 0x107   : > { %p909_p8 = pneg %p908_p7 }
 0x108   : > { %p915_p13 = por %p914_p12, %p913_p11 }
 0x10a   : > { %p916_p0 = pnand %p915_p13, %p909_p8 }
 0x10c   : > { %919 = shalt.err (!%p916_p0)
}
 0x10d   : > { %s958_s9 = smov 64   ;;  %s959_s10 = smov 4  }
 0x10e   : > { %848 = dma.vmem_to_hbm [thread:$0]  (%p1018_p5), %s1111_s19, 1024, %s1109_s25, %s1117_s16, %s958_s9, %s958_s9, %s959_s10  }
 0x10f PF: > { %p854_p1 = scmp.ge.s32.totalorder %s954_s15, 2  ;;  %s627_s11 = sand.u32 1, %s942_s12  }
 0x110   : > { %s628_s17 = scalar_lea.sflag [#allocation3], %s627_s11 }
 0x111   : > { %p851_p2 = pnand %p854_p1, %p1022_p6 }
 0x113   : > { %937 = dma.done.wait (!%p851_p2), %s628_s17, 1024  }
 0x114   : > { %939 = vsyncadd (!%p851_p2), %s628_s17, 4294966272  ;;  %p13_p3 = scmp.ge.s32.totalorder %s1005_s18, 4   ;;  %s1164_s12 = smov %s946_s13 }
 0x115   : > { %s1165_s13 = smov %s950_s14  ;;  %s1166_s14 = smov %s1016_s21 }
 0x116   : > { %s1167_s15 = smov %s1005_s18  ;;  %15 = sbr.rel (!%p13_p3) target bundleno = 3 (0x3), region = 70 }
 0x11d   :  { %633 = vsyncpa [#allocation3], 1 }
 0x11e   :  { %635 = vsyncpa [#allocation3 + $0x1], 1 }

</bundles_post_ra>
